<compile_context>
chip_gen: v7x
topology: tpu7x:2x2x1
jax: 0.10.0
libtpu: 0.0.40
codegen_flags: <defaults>
</compile_context>

<pallas_src>
import functools
import math

import jax
import jax.numpy as jnp
from jax.experimental import pallas as pl
from jax.experimental.pallas import tpu as pltpu


_EPS = 1e-10
_WEIGHT_DECAY = 1e-3
_SIG10 = 1.0 / (1.0 + math.exp(-10.0))   # sigmoid(10): attention saturation

# Tile targets: rows multiple of 8 (sublanes), lanes multiple of 128.
_TN_TARGET = 512
_TM_TARGET = 1024


def _round_cdiv(a, b):
    return (a + b - 1) // b


def _pick_tile(dim, unit, target):
    """Tile size (multiple of `unit`, <= target) minimizing streamed elements
    (cdiv waste) plus a small per-grid-step overhead penalty.  Avoids the
    'round dim up to a multiple of the tile' blow-up for awkward sizes."""
    if dim <= unit:
        return dim                      # full-dim block (legal even when < unit)
    best_t, best_cost = unit, None
    for t in range(unit, target + 1, unit):
        tiles = _round_cdiv(dim, t)
        cost = tiles * t + 4 * unit * tiles
        if best_cost is None or cost < best_cost:
            best_cost, best_t = cost, t
    return best_t


def _drug_loss_partial_kernel(pos_ref, neg_ref, *out_refs, eps, sig10,
                              n_rows, n_cols, n_col_tiles, col_split_offset,
                              skip_overlap, with_attention):
    bpr_ref = out_refs[0]
    att_ref = out_refs[1] if with_attention else None

    tn, tm = neg_ref.shape
    fold_rows = bpr_ref.shape[0]

    s = pl.program_id(0)
    i = pl.program_id(1)
    j = pl.program_id(2)
    col_tile = s * col_split_offset + j

    # Zero the resident accumulators at the start of each column sweep.
    @pl.when(j == 0)
    def _init():
        bpr_ref[...] = jnp.zeros_like(bpr_ref)
        if with_attention:
            att_ref[...] = jnp.zeros_like(att_ref)

    row_ragged = (n_rows % tn) != 0
    col_ragged = (n_cols % tm) != 0

    def _accumulate(log_sig, att):
        bpr_ref[...] += log_sig.reshape(tn // fold_rows, fold_rows, tm).sum(axis=0)
        if with_attention:
            att_ref[...] += att.reshape(tn // fold_rows, fold_rows, tm).sum(axis=0)

    def _tile_body():
        # Stream native dtype; upcast to f32 in-register (v5e VPU has no bf16).
        pos = jnp.clip(pos_ref[...].astype(jnp.float32), -100.0, 100.0)   # (tn, 1)
        neg = jnp.clip(neg_ref[...].astype(jnp.float32), -100.0, 100.0)   # (tn, tm)
        diff = pos - neg                                    # lane broadcast
        sgm = 1.0 / (1.0 + jnp.exp(-diff))                  # single EUP exp + rcp
        log_sig = jnp.log(sgm + eps)                        # BPR term
        # attention = sigmoid(min(|diff|, 10)) == min(max(s, 1-s), sigmoid(10)):
        # reuses sgm, no second exp/divide.
        att = (jnp.minimum(jnp.maximum(sgm, 1.0 - sgm), sig10)
               if with_attention else None)

        if not (row_ragged or col_ragged):
            _accumulate(log_sig, att)
            return

        # Masking only on edge tiles; interior tiles pay zero mask cost.
        edge = []
        if row_ragged:
            edge.append(i == pl.num_programs(1) - 1)
        if col_ragged:
            edge.append(col_tile == n_col_tiles - 1)
        is_edge = functools.reduce(jnp.logical_or, edge)

        @pl.when(jnp.logical_not(is_edge))
        def _interior():
            _accumulate(log_sig, att)

        @pl.when(is_edge)
        def _edge():
            valid = None
            if row_ragged:
                rows = jax.lax.broadcasted_iota(jnp.int32, (tn, 1), 0) + i * tn
                valid = rows < n_rows
            if col_ragged:
                cols = (jax.lax.broadcasted_iota(jnp.int32, (1, tm), 1)
                        + col_tile * tm)
                cmask = cols < n_cols
                valid = cmask if valid is None else jnp.logical_and(valid, cmask)
            _accumulate(jnp.where(valid, log_sig, 0.0),
                        jnp.where(valid, att, 0.0) if with_attention else None)

    if skip_overlap:
        # Odd column-tile count split into two halves: the second half's first
        # step duplicates the first half's last tile -> skip its compute (the
        # block index it loads is valid, so no OOB DMA is ever issued).
        @pl.when(jnp.logical_not(jnp.logical_and(s == 1, j == 0)))
        def _():
            _tile_body()
    else:
        _tile_body()


def _bpr_and_attention_means(pos_scores, neg_scores, *, with_attention, eps=_EPS):
    """Returns (mean(log(sigmoid(diff)+eps)), mean(attention) or None)."""
    neg = neg_scores
    b, m = neg.shape
    pos = jnp.reshape(pos_scores, (b, 1))

    tn = _pick_tile(b, 8, _TN_TARGET)
    tm = _pick_tile(m, 128, _TM_TARGET)
    n_row_tiles = _round_cdiv(b, tn)
    n_col_tiles = _round_cdiv(m, tm)
    fold_rows = 8 if tn % 8 == 0 else tn          # tn < 8 only when b < 8

    # v7x megacore balance: with a single row tile the "parallel" row axis
    # would leave one TensorCore idle, so split the column reduction across a
    # leading parallel axis of size 2 (per-half accumulator slabs summed in
    # the wrapper).  Harmless on single-TC v5e/v6e.
    n_splits = 2 if (n_row_tiles == 1 and n_col_tiles >= 2 and tn % 8 == 0) else 1
    n_col_per_split = _round_cdiv(n_col_tiles, n_splits)
    col_split_offset = n_col_tiles - n_col_per_split        # 0 when n_splits == 1
    skip_overlap = (n_splits * n_col_per_split) != n_col_tiles

    out_rows = n_splits * n_row_tiles * fold_rows
    part_shape = jax.ShapeDtypeStruct((out_rows, tm), jnp.float32)
    out_shapes = (part_shape, part_shape) if with_attention else (part_shape,)
    out_spec = pl.BlockSpec((fold_rows, tm),
                            lambda s, i, j: (s * n_row_tiles + i, 0))
    out_specs = (out_spec,) * len(out_shapes)

    kernel = functools.partial(
        _drug_loss_partial_kernel,
        eps=float(eps), sig10=_SIG10, n_rows=b, n_cols=m,
        n_col_tiles=n_col_tiles, col_split_offset=col_split_offset,
        skip_overlap=skip_overlap, with_attention=with_attention)

    outs = pl.pallas_call(
        kernel,
        out_shape=out_shapes,
        grid_spec=pltpu.PrefetchScalarGridSpec(
            num_scalar_prefetch=0,
            grid=(n_splits, n_row_tiles, n_col_per_split),
            in_specs=[
                pl.BlockSpec((tn, 1), lambda s, i, j: (i, 0)),
                pl.BlockSpec((tn, tm),
                             lambda s, i, j: (i, s * col_split_offset + j)),
            ],
            out_specs=out_specs,
        ),
        compiler_params=pltpu.CompilerParams(
            dimension_semantics=("parallel", "parallel", "arbitrary"),
            vmem_limit_bytes=32 * 1024 * 1024,
        ),
    )(pos, neg)

    count = jnp.float32(b * m)
    log_sig_mean = jnp.sum(outs[0]) / count
    att_mean = jnp.sum(outs[1]) / count if with_attention else None
    return log_sig_mean, att_mean


def personalized_drug_loss(pos_scores, neg_scores, prs_values, expr_values,
                           disease_weights, protein_weights,
                           lambda1=0.01, lambda2=0.01,
                           weight_decay=_WEIGHT_DECAY, eps=_EPS):
    use_prs = (disease_weights is not None and prs_values is not None
               and prs_values.size > 0)
    use_expr = (protein_weights is not None and expr_values is not None
                and expr_values.size > 0)
    with_attention = use_prs or use_expr

    log_sig_mean, att_mean = _bpr_and_attention_means(
        pos_scores, neg_scores, with_attention=with_attention, eps=eps)
    bpr = -log_sig_mean

    prs_term = jnp.float32(0.0)
    expr_term = jnp.float32(0.0)
    l2_reg = jnp.float32(0.0)

    # Tiny weight-normalization / tanh terms: plain JAX (negligible work).
    if use_prs:
        dwn = disease_weights / jnp.maximum(jnp.linalg.norm(disease_weights), 1e-12)
        prs_term = att_mean * jnp.tanh(jnp.sum(dwn * prs_values))
        l2_reg = l2_reg + weight_decay * jnp.linalg.norm(dwn)
    else:
        lambda1 = 0.0
    if use_expr:
        pwn = protein_weights / jnp.maximum(jnp.linalg.norm(protein_weights), 1e-12)
        expr_term = att_mean * jnp.tanh(jnp.sum(pwn * expr_values))
        l2_reg = l2_reg + weight_decay * jnp.linalg.norm(pwn)
    else:
        lambda2 = 0.0

    return (bpr
            + lambda1 * jnp.clip(prs_term, -1.0, 1.0)
            + lambda2 * jnp.clip(expr_term, -1.0, 1.0)
            + l2_reg)


def _sigmoid(x):
    return 1.0 / (1.0 + jnp.exp(-x))


def _reference(pos_scores, neg_scores, prs_values, expr_values,
               disease_weights, protein_weights,
               lambda1=0.01, lambda2=0.01,
               weight_decay=_WEIGHT_DECAY, eps=_EPS):
    """Pure-JAX mirror of PersonalizedDrugLoss.forward (torch semantics)."""
    pos = jnp.clip(jnp.reshape(pos_scores, (-1, 1)).astype(jnp.float32),
                   -100.0, 100.0)
    neg = jnp.clip(neg_scores.astype(jnp.float32), -100.0, 100.0)
    diff = pos - neg
    bpr = -jnp.mean(jnp.log(_sigmoid(diff) + eps))
    prs_term = jnp.float32(0.0)
    expr_term = jnp.float32(0.0)
    l2_reg = jnp.float32(0.0)
    if disease_weights is not None and prs_values is not None and prs_values.size > 0:
        dwn = disease_weights / jnp.maximum(jnp.linalg.norm(disease_weights), 1e-12)
        prs_impact = jnp.tanh(jnp.sum(dwn * prs_values))
        attention = _sigmoid(jnp.clip(jnp.abs(diff), 0.0, 10.0))
        prs_term = jnp.mean(attention * prs_impact)
        l2_reg = l2_reg + weight_decay * jnp.linalg.norm(dwn)
    if protein_weights is not None and expr_values is not None and expr_values.size > 0:
        pwn = protein_weights / jnp.maximum(jnp.linalg.norm(protein_weights), 1e-12)
        expr_impact = jnp.tanh(jnp.sum(pwn * expr_values))
        attention = _sigmoid(jnp.clip(jnp.abs(diff), 0.0, 10.0))
        expr_term = jnp.mean(attention * expr_impact)
        l2_reg = l2_reg + weight_decay * jnp.linalg.norm(pwn)
    return (bpr + lambda1 * jnp.clip(prs_term, -1.0, 1.0)
            + lambda2 * jnp.clip(expr_term, -1.0, 1.0) + l2_reg)


# TODO(synk): dropout and the host-side `.item()` bookkeeping (last_components)
# in the PyTorch module are not used in the returned loss and are not ported.

if __name__ == "__main__":
    key = jax.random.PRNGKey(0)
    keys = jax.random.split(key, 8)

    # Test 1: small shapes, both personalization branches active.
    batch, num_neg = 8, 32
    n_diseases, n_proteins = 5, 7
    pos_scores = jax.random.normal(keys[0], (batch,), dtype=jnp.float32)
    neg_scores = jax.random.normal(keys[1], (batch, num_neg), dtype=jnp.float32)
    prs_values = jax.random.normal(keys[2], (n_diseases,), dtype=jnp.float32)
    expr_values = jax.random.normal(keys[3], (n_proteins,), dtype=jnp.float32)
    disease_weights = 0.001 * jax.random.normal(keys[4], (n_diseases,), dtype=jnp.float32)
    protein_weights = 0.001 * jax.random.normal(keys[5], (n_proteins,), dtype=jnp.float32)

    loss = personalized_drug_loss(pos_scores, neg_scores, prs_values, expr_values,
                                  disease_weights, protein_weights,
                                  lambda1=0.01, lambda2=0.01)
    jax.block_until_ready(loss)
    ref = _reference(pos_scores, neg_scores, prs_values, expr_values,
                     disease_weights, protein_weights, lambda1=0.01, lambda2=0.01)
    assert jnp.allclose(loss, ref, atol=1e-5, rtol=1e-5), (loss, ref)

    # Test 2: no personalization branches -> specialized BPR-only kernel
    # (attention accumulator/output skipped entirely).
    empty = jnp.zeros((0,), dtype=jnp.float32)
    loss2 = personalized_drug_loss(pos_scores, neg_scores, empty, empty, None, None)
    jax.block_until_ready(loss2)
    ref2 = _reference(pos_scores, neg_scores, empty, empty, None, None)
    assert jnp.allclose(loss2, ref2, atol=1e-5, rtol=1e-5), (loss2, ref2)

    # Test 3: ragged B and M (edge-tile masking, no wrapper pad), the v7x
    # column-split path (single row tile, odd column-tile count), and the
    # +-100 clamp extremes.
    b3, m3 = 13, 2560
    pos3 = 30.0 * jax.random.normal(keys[6], (b3,), dtype=jnp.float32)
    neg3 = 30.0 * jax.random.normal(keys[7], (b3, m3), dtype=jnp.float32)
    pos3 = pos3.at[0].set(1000.0).at[1].set(-1000.0)
    loss3 = personalized_drug_loss(pos3, neg3, prs_values, expr_values,
                                   disease_weights, protein_weights)
    jax.block_until_ready(loss3)
    ref3 = _reference(pos3, neg3, prs_values, expr_values,
                      disease_weights, protein_weights)
    assert jnp.allclose(loss3, ref3, atol=1e-5, rtol=1e-5), (loss3, ref3)

    print("KERNEL_OK")
</pallas_src>

<mosaic_0001>
module attributes {stable_mosaic.version = 11 : i64} {
  func.func @_drug_loss_partial_kernel(%arg0: i32, %arg1: i32, %arg2: i32, %arg3: memref<8x1xf32, #tpu.memory_space<vmem>>, %arg4: memref<8x32xf32, #tpu.memory_space<vmem>>, %arg5: memref<8x32xf32, #tpu.memory_space<vmem>>, %arg6: memref<8x32xf32, #tpu.memory_space<vmem>>) attributes {dimension_semantics = [#tpu.dimension_semantics<parallel>, #tpu.dimension_semantics<parallel>, #tpu.dimension_semantics<arbitrary>], iteration_bounds = array<i64: 1, 1, 1>, scalar_prefetch = 0 : i64, scratch_operands = 0 : i64, tpu.core_type = #tpu.core_type<tc>, window_params = [{transform_indices = @transform_0, window_bounds = array<i64: 8, 1>}, {transform_indices = @transform_1, window_bounds = array<i64: 8, 32>}, {transform_indices = @transform_2, window_bounds = array<i64: 8, 32>}, {transform_indices = @transform_3, window_bounds = array<i64: 8, 32>}]} {
    %c0_i32 = arith.constant 0 : i32
    %0 = arith.cmpi eq, %arg2, %c0_i32 : i32
    %1 = arith.extui %0 : i1 to i32
    %c0_i32_0 = arith.constant 0 : i32
    %2 = arith.cmpi ne, %1, %c0_i32_0 : i32
    scf.if %2 {
      %cst_23 = arith.constant 0.000000e+00 : f32
      %40 = vector.broadcast %cst_23 : f32 to vector<8x32xf32>
      %c0_24 = arith.constant 0 : index
      %c0_25 = arith.constant 0 : index
      %41 = vector.load %arg5[%c0_24, %c0_25] : memref<8x32xf32, #tpu.memory_space<vmem>>, vector<8x32xf32>
      tpu.vector_store %arg5[%c0_24, %c0_25], %40 {strides = array<i32>} : memref<8x32xf32, #tpu.memory_space<vmem>>, vector<8x32xf32>,
      %cst_26 = arith.constant 0.000000e+00 : f32
      %42 = vector.broadcast %cst_26 : f32 to vector<8x32xf32>
      %c0_27 = arith.constant 0 : index
      %c0_28 = arith.constant 0 : index
      %43 = vector.load %arg6[%c0_27, %c0_28] : memref<8x32xf32, #tpu.memory_space<vmem>>, vector<8x32xf32>
      tpu.vector_store %arg6[%c0_27, %c0_28], %42 {strides = array<i32>} : memref<8x32xf32, #tpu.memory_space<vmem>>, vector<8x32xf32>,
    } else {
    }
    %c0 = arith.constant 0 : index
    %c0_1 = arith.constant 0 : index
    %3 = vector.load %arg3[%c0, %c0_1] : memref<8x1xf32, #tpu.memory_space<vmem>>, vector<8x1xf32>
    %cst = arith.constant -1.000000e+02 : f32
    %cst_2 = arith.constant 1.000000e+02 : f32
    %4 = vector.broadcast %cst : f32 to vector<8x1xf32>
    %5 = arith.maximumf %4, %3 : vector<8x1xf32>
    %6 = vector.broadcast %cst_2 : f32 to vector<8x1xf32>
    %7 = arith.minimumf %6, %5 : vector<8x1xf32>
    %c0_3 = arith.constant 0 : index
    %c0_4 = arith.constant 0 : index
    %8 = vector.load %arg4[%c0_3, %c0_4] : memref<8x32xf32, #tpu.memory_space<vmem>>, vector<8x32xf32>
    %cst_5 = arith.constant -1.000000e+02 : f32
    %cst_6 = arith.constant 1.000000e+02 : f32
    %9 = vector.broadcast %cst_5 : f32 to vector<8x32xf32>
    %10 = arith.maximumf %9, %8 : vector<8x32xf32>
    %11 = vector.broadcast %cst_6 : f32 to vector<8x32xf32>
    %12 = arith.minimumf %11, %10 : vector<8x32xf32>
    %13 = vector.broadcast %7 : vector<8x1xf32> to vector<8x32xf32>
    %14 = arith.subf %13, %12 : vector<8x32xf32>
    %cst_7 = arith.constant 0.000000e+00 : f32
    %15 = vector.broadcast %cst_7 : f32 to vector<8x32xf32>
    %16 = arith.subf %15, %14 : vector<8x32xf32>
    %17 = math.exp %16 : vector<8x32xf32>
    %cst_8 = arith.constant 1.000000e+00 : f32
    %18 = vector.broadcast %cst_8 : f32 to vector<8x32xf32>
    %19 = arith.addf %18, %17 : vector<8x32xf32>
    %cst_9 = arith.constant 1.000000e+00 : f32
    %20 = vector.broadcast %cst_9 : f32 to vector<8x32xf32>
    %21 = arith.divf %20, %19 : vector<8x32xf32>
    %cst_10 = arith.constant 1.000000e-10 : f32
    %22 = vector.broadcast %cst_10 : f32 to vector<8x32xf32>
    %23 = arith.addf %21, %22 : vector<8x32xf32>
    %24 = math.log %23 : vector<8x32xf32>
    %cst_11 = arith.constant 1.000000e+00 : f32
    %25 = vector.broadcast %cst_11 : f32 to vector<8x32xf32>
    %26 = arith.subf %25, %21 : vector<8x32xf32>
    %27 = arith.maximumf %21, %26 : vector<8x32xf32>
    %cst_12 = arith.constant 0.999954581 : f32
    %28 = vector.broadcast %cst_12 : f32 to vector<8x32xf32>
    %29 = arith.minimumf %27, %28 : vector<8x32xf32>
    %c0_13 = arith.constant 0 : index
    %c0_14 = arith.constant 0 : index
    %30 = vector.load %arg5[%c0_13, %c0_14] : memref<8x32xf32, #tpu.memory_space<vmem>>, vector<8x32xf32>
    %31 = vector.shape_cast %24 : vector<8x32xf32> to vector<1x8x32xf32>
    %cst_15 = arith.constant dense<0.000000e+00> : vector<8x32xf32>
    %32 = vector.multi_reduction <add>, %31, %cst_15 [0] : vector<1x8x32xf32> to vector<8x32xf32>
    %33 = arith.addf %30, %32 : vector<8x32xf32>
    %c0_16 = arith.constant 0 : index
    %c0_17 = arith.constant 0 : index
    %34 = vector.load %arg5[%c0_16, %c0_17] : memref<8x32xf32, #tpu.memory_space<vmem>>, vector<8x32xf32>
    tpu.vector_store %arg5[%c0_16, %c0_17], %33 {strides = array<i32>} : memref<8x32xf32, #tpu.memory_space<vmem>>, vector<8x32xf32>,
    %c0_18 = arith.constant 0 : index
    %c0_19 = arith.constant 0 : index
    %35 = vector.load %arg6[%c0_18, %c0_19] : memref<8x32xf32, #tpu.memory_space<vmem>>, vector<8x32xf32>
    %36 = vector.shape_cast %29 : vector<8x32xf32> to vector<1x8x32xf32>
    %cst_20 = arith.constant dense<0.000000e+00> : vector<8x32xf32>
    %37 = vector.multi_reduction <add>, %36, %cst_20 [0] : vector<1x8x32xf32> to vector<8x32xf32>
    %38 = arith.addf %35, %37 : vector<8x32xf32>
    %c0_21 = arith.constant 0 : index
    %c0_22 = arith.constant 0 : index
    %39 = vector.load %arg6[%c0_21, %c0_22] : memref<8x32xf32, #tpu.memory_space<vmem>>, vector<8x32xf32>
    tpu.vector_store %arg6[%c0_21, %c0_22], %38 {strides = array<i32>} : memref<8x32xf32, #tpu.memory_space<vmem>>, vector<8x32xf32>,
    return
  }
  func.func @transform_0(%arg0: i32, %arg1: i32, %arg2: i32) -> (i32, i32) {
    %c0_i32 = arith.constant 0 : i32
    %c0_i32_0 = arith.constant 0 : i32
    return %arg1, %c0_i32 : i32, i32
  }
  func.func @transform_1(%arg0: i32, %arg1: i32, %arg2: i32) -> (i32, i32) {
    %c0_i32 = arith.constant 0 : i32
    %0 = arith.muli %arg0, %c0_i32 : i32
    %1 = arith.addi %0, %arg2 : i32
    %c0_i32_0 = arith.constant 0 : i32
    return %arg1, %1 : i32, i32
  }
  func.func @transform_2(%arg0: i32, %arg1: i32, %arg2: i32) -> (i32, i32) {
    %c1_i32 = arith.constant 1 : i32
    %0 = arith.muli %arg0, %c1_i32 : i32
    %1 = arith.addi %0, %arg1 : i32
    %c0_i32 = arith.constant 0 : i32
    %c0_i32_0 = arith.constant 0 : i32
    return %1, %c0_i32 : i32, i32
  }
  func.func @transform_3(%arg0: i32, %arg1: i32, %arg2: i32) -> (i32, i32) {
    %c1_i32 = arith.constant 1 : i32
    %0 = arith.muli %arg0, %c1_i32 : i32
    %1 = arith.addi %0, %arg1 : i32
    %c0_i32 = arith.constant 0 : i32
    %c0_i32_0 = arith.constant 0 : i32
    return %1, %c0_i32 : i32, i32
  }
}

</mosaic_0001>

<bundles_post_ra>
// kernel: tpu_custom_call.1
= control target key start
LH: loop header
LB: loop body
LE: loop exit
PB: predicated region body
PF: predicated region fallthrough
CT: control target
= control target key end

     0   :  { %9 = vsyncpa [#allocation3], 0  ;;  %s210_s0 = inlined_call_operand.vmem [shape: f32[8,1], index: 0, kind: input, shape index: {}]   ;;  %s211_s1 = inlined_call_operand.vmem [shape: f32[8,32], index: 1, kind: input, shape index: {}]   ;;  %s212_s2 = inlined_call_operand.hbm [shape: f32[8,32], index: 2, kind: output, shape index: {0}]   ;;  %s213_s3 = inlined_call_operand.hbm [shape: f32[8,32], index: 3, kind: output, shape index: {1}]  }
   0x1   :  { %v24_v0 = vld [vmem:[%s210_s0] sm:$0xff] }
   0x2   :  { %10 = vsyncpa [#allocation5], 0  ;;  %v152_v1 = vmov 0   ;;  %v91_v2 = vclamps-f32 %v24_v0, 100.0  ;;  %vm21_vm0 = vcmask 261120   ;;  %v153_v3 = vmov 0.0  }
   0x3   :  { %97 = vset.pattern.permute.xlu0 %v152_v1  ;;  %22 = vst.msk [vmem:[#allocation2] sm:$0xff] %vm21_vm0, %v153_v3  ;;  %23 = vst.msk [vmem:[#allocation4] sm:$0xff] %vm21_vm0, %v153_v3  ;;  %v27_v4 = vld [vmem:[%s211_s1] sm:$0xff]  ;;  %s154_s0 = smov [#allocation4]  }
   0x4   :  { %32 = vperm.xlu0 %97, %v91_v2   ;;  %v92_v5 = vclamps-f32 %v27_v4, 100.0  ;;  %s79_s16 = sshll.u32 %s154_s0, 4  ;;  %s80_s16 = int_to_ptr.vmem [resolvable:$true] %s79_s16 }
   0x5   :  { %s104_s1 = scalar_lea.vmem %s80_s16, 128  ;;  %p109_p1 = scmp.lt.s32.totalorder %s80_s16, %s80_s16 }
   0x6   :  { %p105_p0 = scmp.ne.s32.totalorder %s80_s16, %s104_s1  ;;  %p110_p2 = scmp.lt.s32.totalorder %s104_s1, %s104_s1 }
   0x8   :  { %p111_p3 = por %p110_p2, %p109_p1 }
   0xa   :  { %v53_v16 = vld [vmem:[#allocation4] sm:$0xff]  ;;  %p112_p4 = pnand %p111_p3, %p105_p0 }
  0x83   :  { %v33_v6 = vpop.permute.xlu0 %32 }
  0x84   :  { %v35_v7 = vsub.f32 %v33_v6, %v92_v5 }
  0x86   :  { %v36_v8 = vsub.f32 0.0, %v35_v7 }
  0x88   :  { %v37_v9 = vmul.f32 1.442695, %v36_v8 }
  0x8a   :  { %98 = vpow2.f32 %v37_v9 }
  0x94   :  { %v99_v10 = vpop.eup %98 }
  0x95   :  { %v39_v11 = vadd.f32 1.0, %v99_v10 }
  0x97   :  { %100 = vrcp.f32 %v39_v11 }
  0xa1   :  { %v101_v12 = vpop.eup %100 }
  0xa2   :  { %v42_v13 = vadd.f32 1e-10, %v101_v12  ;;  %v45_v14 = vsub.f32 1.0, %v101_v12 }
  0xa4   :  { %102 = vlog2.f32 %v42_v13  ;;  %v46_v15 = vmax.f32 %v101_v12, %v45_v14 }
  0xa6   :  { %v47_v17 = vmin.f32 %v46_v15, 0.9999546 }
  0xa8   :  { %v55_v18 = vadd.f32 %v53_v16, %v47_v17 }
  0xaa   :  { %56 = vst.msk [vmem:[#allocation4] sm:$0xff] %vm21_vm0, %v55_v18 }
  0xab   :  { %115 = shalt.err (!%p112_p4)
}
  0xac   :  { %s116_s19 = scalar_lea.hbm %s213_s3, 128 }
  0xad   :  { %p117_p5 = scmp.ne.s32.totalorder %s213_s3, %s116_s19  ;;  %p120_p6 = scmp.lt.u32.totalorder %s116_s19, %s213_s3 }
  0xaf   :  { %p122_p7 = pnand %p120_p6, %p117_p5 }
  0xb1   :  { %125 = shalt.err (!%p122_p7)
}
  0xb2   :  { %82 = dma.vmem_to_hbm [thread:$0]  %s80_s16, 128, %s213_s3, [#allocation5]   ;;  %v103_v19 = vpop.eup %102  ;;  %v48_v20 = vld [vmem:[#allocation2] sm:$0xff] }
  0xb3   :  { %s155_s26 = smov [#allocation2]   ;;  %v44_v21 = vmul.f32 0.6931472, %v103_v19 }
  0xb4   :  { %s66_s27 = sshll.u32 %s155_s26, 4  ;;  %s67_s27 = int_to_ptr.vmem [resolvable:$true] %s66_s27 }
  0xb5   :  { %v50_v22 = vadd.f32 %v48_v20, %v44_v21  ;;  %s126_s28 = scalar_lea.vmem %s67_s27, 128  ;;  %p131_p9 = scmp.lt.s32.totalorder %s67_s27, %s67_s27 }
  0xb6   :  { %p127_p8 = scmp.ne.s32.totalorder %s67_s27, %s126_s28  ;;  %p132_p10 = scmp.lt.s32.totalorder %s126_s28, %s126_s28 }
  0xb7   :  { %52 = vst.msk [vmem:[#allocation2] sm:$0xff] %vm21_vm0, %v50_v22 }
  0xb8   :  { %p133_p11 = por %p132_p10, %p131_p9 }
  0xba   :  { %p134_p12 = pnand %p133_p11, %p127_p8 }
  0xbc   :  { %137 = shalt.err (!%p134_p12)
}
  0xbd   :  { %s138_s3 = scalar_lea.hbm %s212_s2, 128 }
  0xbe   :  { %p139_p13 = scmp.ne.s32.totalorder %s212_s2, %s138_s3  ;;  %p142_p0 = scmp.lt.u32.totalorder %s138_s3, %s212_s2 }
  0xc0   :  { %p144_p1 = pnand %p142_p0, %p139_p13 }
  0xc2   :  { %147 = shalt.err (!%p144_p1)
}
  0xc3   :  { %69 = dma.vmem_to_hbm [thread:$0]  %s67_s27, 128, %s212_s2, [#allocation3]  }
  0xc4   :  { %148 = dma.done.wait [#allocation3], 128  }
  0xc5   :  { %149 = vsyncadd [#allocation3], 4294967168 }
  0xc6   :  { %150 = dma.done.wait [#allocation5], 128  }
  0xc7   :  { %151 = vsyncadd [#allocation5], 4294967168 }
  0xc8   :  { %89 = vsyncpa [#allocation3], 1 }
  0xc9   :  { %90 = vsyncpa [#allocation5], 1 }

</bundles_post_ra>
